<compile_context>
chip_gen: v5e
topology: v5e:2x2
jax: 0.10.0
libtpu: 0.0.40
codegen_flags: <defaults>
</compile_context>

<pallas_src>
import functools

import jax
import jax.numpy as jnp
from jax.experimental import pallas as pl
from jax.experimental.pallas import tpu as pltpu

INPUT_SIZE = 7
HIDDEN = 32
NUM_CLASSES = 4   # len(A) in the original script; A is an external action set, pick 4.


def _round_up(x, m):
    return ((x + m - 1) // m) * m


def _cdiv(a, b):
    return (a + b - 1) // b


def qsa_kernel(x_ref, w1_ref, b1_ref, w2_ref, b2_ref, o_ref):
    # Linear 1 (MXU, bf16 operands / f32 accumulate) + bias + ReLU (VPU),
    # then Linear 2 (MXU) + bias.  Output block is (TB, num_classes).
    x = x_ref[...].astype(jnp.bfloat16)
    w1 = w1_ref[...].astype(jnp.bfloat16)
    h = jnp.dot(x, w1, preferred_element_type=jnp.float32)
    h = jnp.maximum(h + b1_ref[...], 0.0)

    w2 = w2_ref[...].astype(jnp.bfloat16)
    y = jnp.dot(h.astype(jnp.bfloat16), w2,
                preferred_element_type=jnp.float32) + b2_ref[...]
    o_ref[...] = y.astype(o_ref.dtype)


@functools.partial(jax.jit, static_argnames=("tb",))
def qsa_forward(x, w1, b1, w2, b2, *, tb=4096):
    """x: (B, input_size) float32. Returns (B, num_classes) float32."""
    B, F = x.shape
    H = w1.shape[1]
    C = w2.shape[1]

    b1_2d = b1.reshape(1, H)
    b2_2d = b2.reshape(1, C)

    # Batch tile: multiple of 8 sublanes.  For small/medium batches, split into
    # (at least) 2 grid steps so both v7x TensorCores get work.
    tb = max(_round_up(tb, 8), 8)
    if B <= 2 * tb:
        TB = max(_round_up(_cdiv(B, 2), 8), 8)
    else:
        TB = tb
    grid = (_cdiv(B, TB),)

    cost = pl.CostEstimate(
        flops=2 * B * (F * H + H * C),
        transcendentals=0,
        bytes_accessed=(B * F + B * C + F * H + H + H * C + C) * 4,
    )

    out = pl.pallas_call(
        qsa_kernel,
        out_shape=jax.ShapeDtypeStruct((B, C), jnp.float32),
        grid_spec=pl.GridSpec(
            grid=grid,
            in_specs=[
                pl.BlockSpec((TB, F), lambda i: (i, 0)),   # x tile moves with grid
                pl.BlockSpec((F, H), lambda i: (0, 0)),    # weights stay resident
                pl.BlockSpec((1, H), lambda i: (0, 0)),
                pl.BlockSpec((H, C), lambda i: (0, 0)),
                pl.BlockSpec((1, C), lambda i: (0, 0)),
            ],
            out_specs=pl.BlockSpec((TB, C), lambda i: (i, 0)),
        ),
        compiler_params=pltpu.CompilerParams(
            dimension_semantics=("parallel",),   # v7x: shard batch tiles across both TCs
            vmem_limit_bytes=32 << 20,           # headroom on v5e if tb is raised
        ),
        cost_estimate=cost,
    )(x, w1, b1_2d, w2, b2_2d)

    return out


def init_params(key):
    """Deterministic init mimicking torch.nn.Linear default (uniform +/- 1/sqrt(fan_in))."""
    k1, k2, k3, k4 = jax.random.split(key, 4)
    bound1 = 1.0 / jnp.sqrt(INPUT_SIZE)
    bound2 = 1.0 / jnp.sqrt(HIDDEN)
    # Stored already transposed: (in_features, out_features)
    w1 = jax.random.uniform(k1, (INPUT_SIZE, HIDDEN), jnp.float32, -bound1, bound1)
    b1 = jax.random.uniform(k2, (HIDDEN,), jnp.float32, -bound1, bound1)
    w2 = jax.random.uniform(k3, (HIDDEN, NUM_CLASSES), jnp.float32, -bound2, bound2)
    b2 = jax.random.uniform(k4, (NUM_CLASSES,), jnp.float32, -bound2, bound2)
    return w1, b1, w2, b2


def _reference(x, w1, b1, w2, b2):
    return jnp.maximum(x @ w1 + b1, 0.0) @ w2 + b2


if __name__ == "__main__":
    key = jax.random.PRNGKey(0)
    kx, kp, kx2 = jax.random.split(key, 3)
    w1, b1, w2, b2 = init_params(kp)

    # bf16 matmul operands with f32 accumulation -> looser tolerances vs f32 reference.
    ATOL = 2e-2
    RTOL = 2e-2

    # Small case (single/two grid steps).
    batch = 8
    x = jax.random.normal(kx, (batch, INPUT_SIZE), jnp.float32)
    out = jax.block_until_ready(qsa_forward(x, w1, b1, w2, b2))
    ref = _reference(x, w1, b1, w2, b2)
    assert out.shape == (batch, NUM_CLASSES)
    assert jnp.allclose(out, ref, atol=ATOL, rtol=RTOL)

    # Multi-tile case with a ragged batch to exercise the masked partial-block path.
    batch2 = 200
    x2 = jax.random.normal(kx2, (batch2, INPUT_SIZE), jnp.float32)
    out2 = jax.block_until_ready(qsa_forward(x2, w1, b1, w2, b2, tb=64))
    ref2 = _reference(x2, w1, b1, w2, b2)
    assert out2.shape == (batch2, NUM_CLASSES)
    assert jnp.allclose(out2, ref2, atol=ATOL, rtol=RTOL)

    print("KERNEL_OK")
</pallas_src>

<mosaic_0001>
module attributes {stable_mosaic.version = 11 : i64} {
  func.func @qsa_kernel(%arg0: i32, %arg1: memref<8x7xf32, #tpu.memory_space<vmem>>, %arg2: memref<7x32xf32, #tpu.memory_space<vmem>>, %arg3: memref<1x32xf32, #tpu.memory_space<vmem>>, %arg4: memref<32x4xf32, #tpu.memory_space<vmem>>, %arg5: memref<1x4xf32, #tpu.memory_space<vmem>>, %arg6: memref<8x4xf32, #tpu.memory_space<vmem>>) attributes {dimension_semantics = [#tpu.dimension_semantics<parallel>], iteration_bounds = array<i64: 1>, scalar_prefetch = 0 : i64, scratch_operands = 0 : i64, tpu.core_type = #tpu.core_type<tc>, window_params = [{transform_indices = @transform_0, window_bounds = array<i64: 8, 7>}, {pipeline_mode = #tpu.pipeline_mode<synchronous>, transform_indices = @transform_1, window_bounds = array<i64: 7, 32>}, {pipeline_mode = #tpu.pipeline_mode<synchronous>, transform_indices = @transform_2, window_bounds = array<i64: 1, 32>}, {pipeline_mode = #tpu.pipeline_mode<synchronous>, transform_indices = @transform_3, window_bounds = array<i64: 32, 4>}, {pipeline_mode = #tpu.pipeline_mode<synchronous>, transform_indices = @transform_4, window_bounds = array<i64: 1, 4>}, {transform_indices = @transform_5, window_bounds = array<i64: 8, 4>}]} {
    %c0 = arith.constant 0 : index
    %c0_0 = arith.constant 0 : index
    %0 = vector.load %arg1[%c0, %c0_0] : memref<8x7xf32, #tpu.memory_space<vmem>>, vector<8x7xf32>
    %1 = arith.truncf %0 : vector<8x7xf32> to vector<8x7xbf16>
    %c0_1 = arith.constant 0 : index
    %c0_2 = arith.constant 0 : index
    %2 = vector.load %arg2[%c0_1, %c0_2] : memref<7x32xf32, #tpu.memory_space<vmem>>, vector<7x32xf32>
    %3 = arith.truncf %2 : vector<7x32xf32> to vector<7x32xbf16>
    %cst = arith.constant dense<0.000000e+00> : vector<8x32xf32>
    %4 = tpu.matmul %1, %3, %cst {dimension_numbers = #tpu.dot_dimension_numbers<[1], [0], [0], [1], [0, 0, 1, 1], [], []>} : vector<8x7xbf16>, vector<7x32xbf16>, vector<8x32xf32> -> vector<8x32xf32>
    %c0_3 = arith.constant 0 : index
    %c0_4 = arith.constant 0 : index
    %5 = vector.load %arg3[%c0_3, %c0_4] : memref<1x32xf32, #tpu.memory_space<vmem>>, vector<1x32xf32>
    %6 = vector.broadcast %5 : vector<1x32xf32> to vector<8x32xf32>
    %7 = arith.addf %4, %6 : vector<8x32xf32>
    %cst_5 = arith.constant 0.000000e+00 : f32
    %8 = vector.broadcast %cst_5 : f32 to vector<8x32xf32>
    %9 = arith.maximumf %7, %8 : vector<8x32xf32>
    %c0_6 = arith.constant 0 : index
    %c0_7 = arith.constant 0 : index
    %10 = vector.load %arg4[%c0_6, %c0_7] : memref<32x4xf32, #tpu.memory_space<vmem>>, vector<32x4xf32>
    %11 = arith.truncf %10 : vector<32x4xf32> to vector<32x4xbf16>
    %12 = arith.truncf %9 : vector<8x32xf32> to vector<8x32xbf16>
    %cst_8 = arith.constant dense<0.000000e+00> : vector<8x4xf32>
    %13 = tpu.matmul %12, %11, %cst_8 {dimension_numbers = #tpu.dot_dimension_numbers<[1], [0], [0], [1], [0, 0, 1, 1], [], []>} : vector<8x32xbf16>, vector<32x4xbf16>, vector<8x4xf32> -> vector<8x4xf32>
    %c0_9 = arith.constant 0 : index
    %c0_10 = arith.constant 0 : index
    %14 = vector.load %arg5[%c0_9, %c0_10] : memref<1x4xf32, #tpu.memory_space<vmem>>, vector<1x4xf32>
    %15 = vector.broadcast %14 : vector<1x4xf32> to vector<8x4xf32>
    %16 = arith.addf %13, %15 : vector<8x4xf32>
    %c0_11 = arith.constant 0 : index
    %c0_12 = arith.constant 0 : index
    %17 = vector.load %arg6[%c0_11, %c0_12] : memref<8x4xf32, #tpu.memory_space<vmem>>, vector<8x4xf32>
    tpu.vector_store %arg6[%c0_11, %c0_12], %16 {strides = array<i32>} : memref<8x4xf32, #tpu.memory_space<vmem>>, vector<8x4xf32>,
    return
  }
  func.func @transform_0(%arg0: i32) -> (i32, i32) {
    %c0_i32 = arith.constant 0 : i32
    %c0_i32_0 = arith.constant 0 : i32
    return %arg0, %c0_i32 : i32, i32
  }
  func.func @transform_1(%arg0: i32) -> (i32, i32) {
    %c0_i32 = arith.constant 0 : i32
    %c0_i32_0 = arith.constant 0 : i32
    %c0_i32_1 = arith.constant 0 : i32
    return %c0_i32, %c0_i32_0 : i32, i32
  }
  func.func @transform_2(%arg0: i32) -> (i32, i32) {
    %c0_i32 = arith.constant 0 : i32
    %c0_i32_0 = arith.constant 0 : i32
    %c0_i32_1 = arith.constant 0 : i32
    return %c0_i32, %c0_i32_0 : i32, i32
  }
  func.func @transform_3(%arg0: i32) -> (i32, i32) {
    %c0_i32 = arith.constant 0 : i32
    %c0_i32_0 = arith.constant 0 : i32
    %c0_i32_1 = arith.constant 0 : i32
    return %c0_i32, %c0_i32_0 : i32, i32
  }
  func.func @transform_4(%arg0: i32) -> (i32, i32) {
    %c0_i32 = arith.constant 0 : i32
    %c0_i32_0 = arith.constant 0 : i32
    %c0_i32_1 = arith.constant 0 : i32
    return %c0_i32, %c0_i32_0 : i32, i32
  }
  func.func @transform_5(%arg0: i32) -> (i32, i32) {
    %c0_i32 = arith.constant 0 : i32
    %c0_i32_0 = arith.constant 0 : i32
    return %arg0, %c0_i32 : i32, i32
  }
}

</mosaic_0001>

<bundles_post_ra>
// kernel: qsa_forward.1
= control target key start
LH: loop header
LB: loop body
LE: loop exit
PB: predicated region body
PF: predicated region fallthrough
CT: control target
= control target key end

     0   :  { %vm33_vm0 = vcmask 1042432   ;;  %vm34_vm1 = vcmask 1043456   ;;  %v93_v1 = vmov 65535   ;;  %vm29_vm2 = vcmask 56320   ;;  %s151_s1 = inlined_call_operand.vmem [shape: f32[7,32], index: 1, kind: input, shape index: {}]   ;;  %s152_s0 = inlined_call_operand.vmem [shape: f32[8,7], index: 0, kind: input, shape index: {}]   ;;  %s153_s2 = inlined_call_operand.vmem [shape: f32[1,32], index: 2, kind: input, shape index: {}]   ;;  %s154_s4 = inlined_call_operand.vmem [shape: f32[1,4], index: 4, kind: input, shape index: {}]   ;;  %s155_s3 = inlined_call_operand.vmem [shape: f32[32,4], index: 3, kind: input, shape index: {}]   ;;  %s156_s5 = inlined_call_operand.vmem [shape: f32[8,4], index: 5, kind: output, shape index: {}]  }
   0x1   :  { %v23_v0 = vld [vmem:[%s151_s1] sm:$0x7f]  ;;  %v35_v2 = vsel %vm33_vm0, 4294967295, %v93_v1  ;;  %v56_v8 = vld [vmem:[%s155_s3 + $0x10] sm:$0xff]  ;;  %v57_v9 = vld [vmem:[%s155_s3 + $0x18] sm:$0xff]  ;;  %vm65_vm3 = vcmask 261120  }
   0x2   :  { %v24_v3 = vpack.c.bf16 %v23_v0, %v23_v0  ;;  %v36_v4 = vsel %vm34_vm1, %v35_v2, 0  ;;  %v21_v5 = vld [vmem:[%s152_s0] sm:$0xff]  ;;  %v59_v10 = vpack.c.bf16 %v57_v9, %v56_v8  ;;  %v55_v12 = vld [vmem:[%s155_s3 + $0x8] sm:$0xff]  ;;  %vm82_vm4 = vcmask 31744  }
   0x3   :  { %v22_v7 = vpack.c.bf16 %v21_v5, %v21_v5  ;;  %v54_v11 = vld [vmem:[%s155_s3] sm:$0xff] }
   0x4   :  { %v38_v6 = vand.u32 %v36_v4, %v24_v3  ;;  %75 = vmatpush.bf16.msra.mxu1 %v59_v10  ;;  %v58_v13 = vpack.c.bf16 %v55_v12, %v54_v11  ;;  %v91_v14 = vld [vmem:[%s153_s2] ss:$0 sm:$0xff] }
   0x5   :  { %v92_v20 = vld [vmem:[%s154_s4] ss:$0 sm:$0xff] }
   0x6   :  { %47 = vmatpush.bf16.msra.mxu0 %v38_v6 }
   0x8   :  { %76 = vmatpush.bf16.msra.mxu1 %v58_v13 }
   0x9   :  { %88 = vmatmul.msk.bf16.vlgmr.msra.gmra.mxu0 %vm29_vm2, %v22_v7 }
  0x86   :  { %v49_v15 = vpop.f32.mrf.mxu0 }
  0x87   :  { %v50_v16 = vadd.f32 %v91_v14, %v49_v15 }
  0x89   :  { %v53_v17 = vmax.f32 %v50_v16, 0.0 }
  0x8b   :  { %v60_v18 = vpack.c.bf16 %v53_v17, %v53_v17 }
  0x8d   :  { %89 = vmatmul.msk.bf16.vlgmr.msra.gmra.mxu1 %vm65_vm3, %v60_v18 }
  0x8e   :  { %v51_v19 = vpop.f32.mrf.mxu0 }
 0x10a   :  { %v78_v21 = vpop.f32.mrf.mxu1 }
 0x10b   :  { %v79_v22 = vadd.f32 %v92_v20, %v78_v21 }
 0x10d   :  { %83 = vst.msk [vmem:[%s156_s5] sm:$0xff] %vm82_vm4, %v79_v22 }
 0x112   :  { %v80_v23 = vpop.f32.mrf.mxu1 }

</bundles_post_ra>
